<compile_context>
chip_gen: v6e
topology: v6e:2x2x1
jax: 0.10.0
libtpu: 0.0.40
codegen_flags: <defaults>
</compile_context>

<pallas_src>
import jax
import jax.numpy as jnp
from jax.experimental import pallas as pl
from jax.experimental.pallas import tpu as pltpu

# ----------------------- synthetic model configuration ----------------------
VOCAB = 64          # vocab size of the synthetic base model
D_MODEL = 128       # base_model.config.d_model
N_TOKENS = 8        # soft-prompt length
LORA_R = 8          # LoRA rank
LORA_ALPHA = 16
LORA_SCALING = float(LORA_ALPHA) / float(LORA_R)


def _round_up(x, m):
    return ((x + m - 1) // m) * m


NUM_TABLE_ROWS = N_TOKENS + VOCAB                 # real rows in the combined table (72)
TABLE_ROWS_PAD = _round_up(NUM_TABLE_ROWS, 128)   # padded to a lane-dense 128 rows


# ------------------------------- Pallas kernel -------------------------------
def _lora_embed_proj_kernel(ids_ref, table_ref, o_ref):
    """Fused (soft-prompt ++ embedding) gather with the LoRA-folded projection
    pre-applied to the table.

    ids_ref   : (tq, 1)      int32  -- combined row ids into `table_ref`
    table_ref : (V_pad, D)   bf16   -- ([soft_prompt ; embedding] @ W_eff), zero-padded rows
    o_ref     : (tq, D)      bf16   -- projected hidden states (f32 accumulation inside)
    """
    tq = ids_ref.shape[0]
    v_pad = table_ref.shape[0]

    # Row gather as a lane-dense one-hot MXU matmul (exact selection; f32 accumulation).
    ids = ids_ref[...]                                               # (tq, 1) int32
    row_iota = jax.lax.broadcasted_iota(jnp.int32, (tq, v_pad), 1)   # (tq, V_pad)
    onehot = (ids == row_iota).astype(table_ref.dtype)               # (tq, V_pad) bf16
    y = jnp.dot(onehot, table_ref[...], preferred_element_type=jnp.float32)   # (tq, D) f32
    o_ref[...] = y.astype(o_ref.dtype)


def lora_embed_proj(ids2d, table_eff, *, tq, out_dtype=jnp.bfloat16):
    """Run the fused gather+folded-projection kernel over a flattened [M_pad, 1] id slab."""
    M_pad, _ = ids2d.shape
    V_pad, D = table_eff.shape
    assert M_pad % tq == 0 and tq % 16 == 0
    assert V_pad % 128 == 0 and D % 128 == 0

    grid = (M_pad // tq,)
    return pl.pallas_call(
        _lora_embed_proj_kernel,
        out_shape=jax.ShapeDtypeStruct((M_pad, D), out_dtype),
        grid_spec=pltpu.PrefetchScalarGridSpec(
            num_scalar_prefetch=0,
            grid=grid,
            in_specs=[
                # row ids for this row tile
                pl.BlockSpec((tq, 1), lambda q: (q, 0)),
                # folded lookup table: full block, grid-invariant, VMEM resident (32 KiB)
                pl.BlockSpec((V_pad, D), lambda q: (0, 0)),
            ],
            out_specs=pl.BlockSpec((tq, D), lambda q: (q, 0)),
        ),
        compiler_params=pltpu.CompilerParams(
            dimension_semantics=("parallel",)),
    )(ids2d, table_eff)


# --------------------- one-time parameter fold (frozen) -----------------------
def fold_lora_params(params):
    """Hoisted out of the hot path: build the combined (soft-prompt ++ embedding) lookup
    table with the LoRA-augmented projection pre-applied, pad to a 128-row multiple and
    cast to bf16 for the MXU.  Valid while the table stays small (72 rows here)."""
    w_eff = params["w"] + LORA_SCALING * (params["lora_a"] @ params["lora_b"])
    table = jnp.concatenate([params["soft_prompt"], params["embedding"]], axis=0)   # [V, D]
    table_eff = jnp.dot(table, w_eff, precision=jax.lax.Precision.HIGHEST)          # [V, D] f32
    v, _ = table_eff.shape
    table_eff = jnp.pad(table_eff, ((0, TABLE_ROWS_PAD - v), (0, 0)))               # zero rows
    return table_eff.astype(jnp.bfloat16)


def _pick_row_tile(m):
    # Large tiles amortize the ~0.35us per-grid-step overhead; keep >=2 steps whenever
    # possible so v7x's two TensorCores both get work even when B == 1.
    return max(16, min(512, _round_up(pl.cdiv(m, 2), 16)))


# --------------------------- LoRA-wrapper forward -----------------------------
def hybrid_peft_forward(table_eff, input_ids, attention_mask, *, out_dtype=jnp.bfloat16):
    """Mirrors the wrapped PEFT model forward: soft-prompt concat + mask extension +
    LoRA-augmented linear projection of the embedded sequence."""
    B, S = input_ids.shape
    V_pad, D = table_eff.shape
    T = N_TOKENS + S

    # --- attention-mask extension (glue) ---
    ext_mask = jnp.concatenate(
        [jnp.ones((B, N_TOKENS), dtype=attention_mask.dtype), attention_mask], axis=1)

    # --- combined position -> table-row ids (soft-prompt rows, then shifted token ids) ---
    prompt_ids = jnp.broadcast_to(
        jnp.arange(N_TOKENS, dtype=jnp.int32)[None, :], (B, N_TOKENS))
    full_ids = jnp.concatenate(
        [prompt_ids, input_ids.astype(jnp.int32) + N_TOKENS], axis=1)               # [B, T]
    # NOTE: out-of-range token ids produce an all-zero one-hot row (silent zero output),
    # closer to jnp.take's clamping than torch's hard error; clamp upstream if untrusted.

    # --- flatten (B, T) into one row axis, pad to a tile multiple ---
    M = B * T
    tq = _pick_row_tile(M)
    M_pad = _round_up(M, tq)
    ids_flat = full_ids.reshape(M, 1)
    if M_pad != M:
        # padded tail rows select an all-zero table row; they are sliced off below
        pad_row = NUM_TABLE_ROWS if V_pad > NUM_TABLE_ROWS else 0
        ids_flat = jnp.pad(ids_flat, ((0, M_pad - M), (0, 0)), constant_values=pad_row)

    out = lora_embed_proj(ids_flat, table_eff, tq=tq, out_dtype=out_dtype)
    hidden = out[:M].reshape(B, T, D)

    # TODO(synk): the full seq2seq base model (attention stack, decoder, loss from `labels`)
    # is not reproducible from this wrapper alone; only the PEFT math (soft-prompt concat +
    # mask extension + LoRA-augmented linear projection of the embedded sequence) is kernelized.
    return hidden, ext_mask


# ----------------------------------- main ------------------------------------
if __name__ == "__main__":
    key = jax.random.PRNGKey(0)
    k_emb, k_w, k_a, k_ids = jax.random.split(key, 4)

    # Deterministic parameter init (shapes implied by the module's __init__).
    embedding = jax.random.normal(k_emb, (VOCAB, D_MODEL), jnp.float32) * 0.02
    # initialize_from_vocab=True -> soft prompt = first n_tokens rows of the embedding.
    soft_prompt = embedding[:N_TOKENS]
    w = jax.random.normal(k_w, (D_MODEL, D_MODEL), jnp.float32) * 0.02
    lora_a = jax.random.normal(k_a, (D_MODEL, LORA_R), jnp.float32) * 0.02
    lora_b = jnp.full((LORA_R, D_MODEL), 0.01, jnp.float32)  # nonzero so LoRA path is exercised

    params = {
        "embedding": embedding,
        "soft_prompt": soft_prompt,
        "w": w,
        "lora_a": lora_a,
        "lora_b": lora_b,
    }

    # One-time fold of the frozen params (hoisted out of the jitted forward).
    table_eff = fold_lora_params(params)
    jax.block_until_ready(table_eff)

    # Small example: batch=2, seq=120 -> T = 128, M = 256 rows -> two 128-row tiles.
    B, S = 2, 120
    input_ids = jax.random.randint(k_ids, (B, S), 0, VOCAB, dtype=jnp.int32)
    attention_mask = jnp.ones((B, S), dtype=jnp.int32)

    fwd = jax.jit(hybrid_peft_forward)
    hidden, ext_mask = fwd(table_eff, input_ids, attention_mask)
    jax.block_until_ready((hidden, ext_mask))

    # ----------------------------- reference checks -----------------------------
    T = N_TOKENS + S
    emb_tok = jnp.take(embedding, input_ids, axis=0)                                # [B, S, D]
    x_full = jnp.concatenate(
        [jnp.broadcast_to(soft_prompt[None], (B, N_TOKENS, D_MODEL)), emb_tok], axis=1)
    # Original unfused f32 LoRA formula.
    ref_f32 = x_full @ w + LORA_SCALING * ((x_full @ lora_a) @ lora_b)
    mask_ref = jnp.concatenate(
        [jnp.ones((B, N_TOKENS), jnp.int32), attention_mask], axis=1)

    assert hidden.shape == (B, T, D_MODEL)
    assert hidden.dtype == jnp.bfloat16
    assert ext_mask.shape == (B, T)
    max_err = float(jnp.max(jnp.abs(hidden.astype(jnp.float32) - ref_f32)))
    assert max_err < 2e-3, f"max abs error {max_err}"
    assert jnp.array_equal(ext_mask, mask_ref)

    print("KERNEL_OK")
</pallas_src>

<mosaic_0001>
module attributes {stable_mosaic.version = 11 : i64} {
  func.func @_lora_embed_proj_kernel(%arg0: i32, %arg1: memref<128x1xi32, #tpu.memory_space<vmem>>, %arg2: memref<128x128xbf16, #tpu.memory_space<vmem>>, %arg3: memref<128x128xbf16, #tpu.memory_space<vmem>>) attributes {dimension_semantics = [#tpu.dimension_semantics<parallel>], iteration_bounds = array<i64: 2>, scalar_prefetch = 0 : i64, scratch_operands = 0 : i64, tpu.core_type = #tpu.core_type<tc>, window_params = [{transform_indices = @transform_0, window_bounds = array<i64: 128, 1>}, {pipeline_mode = #tpu.pipeline_mode<synchronous>, transform_indices = @transform_1, window_bounds = array<i64: 128, 128>}, {transform_indices = @transform_2, window_bounds = array<i64: 128, 128>}]} {
    %c0 = arith.constant 0 : index
    %c0_0 = arith.constant 0 : index
    %0 = vector.load %arg1[%c0, %c0_0] : memref<128x1xi32, #tpu.memory_space<vmem>>, vector<128x1xi32>
    %1 = tpu.iota {dimensions = array<i32: 1>} : vector<128x128xi32>
    %2 = vector.broadcast %0 : vector<128x1xi32> to vector<128x128xi32>
    %3 = arith.cmpi eq, %2, %1 : vector<128x128xi32>
    %4 = arith.extui %3 : vector<128x128xi1> to vector<128x128xi32>
    %5 = arith.sitofp %4 : vector<128x128xi32> to vector<128x128xf32>
    %6 = arith.truncf %5 : vector<128x128xf32> to vector<128x128xbf16>
    %c0_1 = arith.constant 0 : index
    %c0_2 = arith.constant 0 : index
    %7 = vector.load %arg2[%c0_1, %c0_2] : memref<128x128xbf16, #tpu.memory_space<vmem>>, vector<128x128xbf16>
    %cst = arith.constant dense<0.000000e+00> : vector<128x128xf32>
    %8 = tpu.matmul %6, %7, %cst {dimension_numbers = #tpu.dot_dimension_numbers<[1], [0], [0], [1], [0, 0, 1, 1], [], []>} : vector<128x128xbf16>, vector<128x128xbf16>, vector<128x128xf32> -> vector<128x128xf32>
    %9 = arith.truncf %8 : vector<128x128xf32> to vector<128x128xbf16>
    %c0_3 = arith.constant 0 : index
    %c0_4 = arith.constant 0 : index
    %10 = vector.load %arg3[%c0_3, %c0_4] : memref<128x128xbf16, #tpu.memory_space<vmem>>, vector<128x128xbf16>
    tpu.vector_store %arg3[%c0_3, %c0_4], %9 {strides = array<i32>} : memref<128x128xbf16, #tpu.memory_space<vmem>>, vector<128x128xbf16>,
    return
  }
  func.func @transform_0(%arg0: i32) -> (i32, i32) {
    %c0_i32 = arith.constant 0 : i32
    %c0_i32_0 = arith.constant 0 : i32
    return %arg0, %c0_i32 : i32, i32
  }
  func.func @transform_1(%arg0: i32) -> (i32, i32) {
    %c0_i32 = arith.constant 0 : i32
    %c0_i32_0 = arith.constant 0 : i32
    %c0_i32_1 = arith.constant 0 : i32
    return %c0_i32, %c0_i32_0 : i32, i32
  }
  func.func @transform_2(%arg0: i32) -> (i32, i32) {
    %c0_i32 = arith.constant 0 : i32
    %c0_i32_0 = arith.constant 0 : i32
    return %arg0, %c0_i32 : i32, i32
  }
}

</mosaic_0001>

<bundles_post_ra>
// kernel: hybrid_peft_forward.1
= control target key start
LH: loop header
LB: loop body
LE: loop exit
PB: predicated region body
PF: predicated region fallthrough
CT: control target
= control target key end

     0   :  { %7 = vsyncpa [#allocation3], 0  ;;  %s1063_s0 = inlined_call_operand.vmem [shape: s32[256,1], index: 0, kind: input, shape index: {}]   ;;  %s1064_s1 = inlined_call_operand.vmem [shape: bf16[128,128], index: 1, kind: input, shape index: {}]   ;;  %s1065_s2 = inlined_call_operand.hbm [shape: bf16[256,128], index: 2, kind: output, shape index: {}]  }
   0x1   :  { %9 = vsyncpa [#allocation3 + $0x1], 0  ;;  %s916_s9 = smov 0   ;;  %s918_s10 = smov 0  }
   0x2   :  { %s920_s11 = smov 0   ;;  %s922_s12 = smov 0  }
   0x3 LB: > { %s937_s13 = sadd.s32 4294967295, %s894_s12   ;;  %s585_s14 = sadd.s32 4294967294, %s894_s12   ;;  %s894_s12 = sphi %s922_s12, %s1071_s12   ;;  %s890_s11 = sphi %s920_s11, %s1070_s11   ;;  %s886_s10 = sphi %s918_s10, %s1069_s10   ;;  %s882_s9 = sphi %s916_s9, %s1068_s9  }
   0x4   : > { %s941_s15 = sadd.s32 1, %s894_s12   ;;  %s69_s16 = sadd.s32 1, %s890_s11 }
   0x5   : > { %s66_s17 = ssub.s32 %s894_s12, %s941_s15  ;;  %p79_p0 = scmp.ne.s32.totalorder %s890_s11, %s886_s10 }
   0x6   : > { %p67_p1 = scmp.eq.s32.totalorder %s66_s17, 0  ;;  %p80_p2 = scmp.eq.s32.totalorder %s937_s13, 1 }
   0x7   : > { %p85_p3 = scmp.ne.s32.totalorder %s886_s10, %s882_s9  ;;  %p86_p4 = scmp.eq.s32.totalorder %s585_s14, 1 }
   0x8   : > { %s952_s18 = scalar_select %p67_p1, %s890_s11, %s69_s16  }
   0x9   : > { %p954_p5 = por %p80_p2, %p79_p0  ;;  %p958_p6 = por %p86_p4, %p85_p3 }
   0xa   : > { %p588_p7 = scmp.ge.s32.totalorder %s894_s12, 1  ;;  %p116_p8 = scmp.lt.s32.totalorder %s894_s12, 3 }
   0xc   : > { %p117_p9 = pnand %p588_p7, %p116_p8 }
   0xd   : > { %s590_s21 = sshll.u32 (!%p117_p9), %s937_s13, 4  ;;  %s135_s23 = sand.u32 (!%p117_p9), 1, %s886_s10  }
   0xe   : > { %120 = sbr.rel (%p117_p9) target bundleno = 393 (0x189), region = 28  ;;  %p139_p10 = scmp.lt.s32.totalorder (!%p117_p9), %s590_s21, 31 }
   0xf   : > { %s589_s24 = sshll.u32 (!%p117_p9), %s135_s23, 6  ;;  %s898_s4 = smov (!%p117_p9), [#allocation2]  }
  0x10   : > { %s137_s25 = scalar_lea.vmem (!%p117_p9), [#allocation2], %s589_s24  ;;  %s838_s5 = sshll.u32 (!%p117_p9), %s898_s4, 4  ;;  %s839_s5 = int_to_ptr.vmem [resolvable:$false] %s838_s5 }
  0x11   : > { %s523_s27 = sshll.u32 (!%p117_p9), %s137_s25, 4  ;;  %s840_s6 = scalar_lea.vmem (!%p117_p9), %s839_s5, 2048  ;;  %s1019_s27 = int_to_ptr.vmem [resolvable:$true] %s523_s27 }
  0x12   : > { %s834_s3 = scalar_lea.vmem (!%p117_p9), %s1019_s27, 1024  ;;  %p841_p0 = scmp.lt.s32.totalorder (!%p117_p9), %s1019_s27, %s839_s5 }
  0x13   : > { %v896_v0 = vmov 0   ;;  %v826_v1 = vld [vmem:[%s1064_s1 + $0x38] sm:$0xff]   ;;  %v827_v2 = vld [vmem:[%s1064_s1 + $0x30] sm:$0xff]   ;;  %s1073_s21 = smov (!%p139_p10, %s590_s21), 31  ;;  %v828_v3 = vld [vmem:[%s1064_s1 + $0x28] sm:$0xff]   ;;  %v162_v25 = vlaneseq  ;;  %p835_p11 = scmp.ne.s32.totalorder %s1019_s27, %s834_s3 }
  0x14   : > { %825 = vset.pattern.permute.xlu1 %v896_v0  ;;  %824 = vset.pattern.permute.xlu0 %v896_v0  ;;  %s591_s26 = sshll.u32 %s1073_s21, 3  ;;  %v829_v8 = vld [vmem:[%s1064_s1 + $0x20] sm:$0xff]   ;;  %v830_v11 = vld [vmem:[%s1064_s1 + $0x18] sm:$0xff]   ;;  %v831_v14 = vld [vmem:[%s1064_s1 + $0x10] sm:$0xff]   ;;  %v897_v31 = vmov 1.0|1.0   ;;  %p842_p1 = scmp.lt.s32.totalorder %s840_s6, %s834_s3 }
  0x15   : > { %733 = vmatprep.subr.bf16.mxu0 %v826_v1  ;;  %765 = vmatprep.subr.bf16.mxu1 %v826_v1  ;;  %s974_s29 = scalar_lea.vmem %s1063_s0, %s591_s26  ;;  %v832_v17 = vld [vmem:[%s1064_s1 + $0x8] sm:$0xff]   ;;  %v833_v20 = vld [vmem:[%s1064_s1] sm:$0xff]   ;;  %v163_v28 = vand.u32 127, %v162_v25  ;;  %s669_s26 = sshll.u32 %s937_s13, 10 }
  0x16   : > { %734 = vmatpush3.bf16.msra.mxu0 %v826_v1  ;;  %773 = vmatpush3.bf16.msra.mxu1 %v826_v1  ;;  %v154_v4 = vld [vmem:[%s974_s29 + $0x40] sm:$0xff]  ;;  %v155_v6 = vld [vmem:[%s974_s29 + $0x48] sm:$0xff]  ;;  %v149_v9 = vld [vmem:[%s974_s29 + $0x18] sm:$0xff]  ;;  %s1017_s30 = scalar_lea.hbm %s1065_s2, %s669_s26  ;;  %s1023_s13 = scalar_lea.sflag [#allocation3], %s135_s23 }
  0x17   : > { %735 = vmatprep.subr.bf16.mxu0 %v827_v2  ;;  %766 = vmatprep.subr.bf16.mxu1 %v827_v2  ;;  %v146_v5 = vld [vmem:[%s974_s29] sm:$0xff]  ;;  %v147_v7 = vld [vmem:[%s974_s29 + $0x8] sm:$0xff]  ;;  %v148_v10 = vld [vmem:[%s974_s29 + $0x10] sm:$0xff]  ;;  %p836_p12 = pnand %p835_p11, %p954_p5  ;;  %p843_p2 = por %p842_p1, %p841_p0 }
  0x18   : > { %189 = vperm.xlu1 %825, %v154_v4   ;;  %165 = vperm.xlu0 %824, %v146_v5   ;;  %v157_v12 = vld [vmem:[%s974_s29 + $0x58] sm:$0xff]  ;;  %v156_v13 = vld [vmem:[%s974_s29 + $0x50] sm:$0xff]  ;;  %v151_v15 = vld [vmem:[%s974_s29 + $0x28] sm:$0xff] }
  0x19   : > { %v150_v16 = vld [vmem:[%s974_s29 + $0x20] sm:$0xff]  ;;  %v159_v18 = vld [vmem:[%s974_s29 + $0x68] sm:$0xff]  ;;  %v153_v21 = vld [vmem:[%s974_s29 + $0x38] sm:$0xff]  ;;  %p837_p13 = pneg %p836_p12 }
  0x1a   : > { %736 = vmatpush3.bf16.msra.mxu0 %v827_v2  ;;  %774 = vmatpush3.bf16.msra.mxu1 %v827_v2  ;;  %v158_v19 = vld [vmem:[%s974_s29 + $0x60] sm:$0xff]  ;;  %v152_v22 = vld [vmem:[%s974_s29 + $0x30] sm:$0xff]  ;;  %v161_v23 = vld [vmem:[%s974_s29 + $0x78] sm:$0xff] }
  0x1b   : > { %737 = vmatprep.subr.bf16.mxu0 %v828_v3  ;;  %767 = vmatprep.subr.bf16.mxu1 %v828_v3  ;;  %v160_v24 = vld [vmem:[%s974_s29 + $0x70] sm:$0xff]  ;;  %p844_p3 = pnand %p843_p2, %p837_p13 }
  0x1c   : > { %192 = vperm.xlu1 %825, %v155_v6   ;;  %168 = vperm.xlu0 %824, %v147_v7  }
  0x1e   : > { %738 = vmatpush3.bf16.msra.mxu0 %v828_v3  ;;  %775 = vmatpush3.bf16.msra.mxu1 %v828_v3 }
  0x1f   : > { %739 = vmatprep.subr.bf16.mxu0 %v829_v8  ;;  %768 = vmatprep.subr.bf16.mxu1 %v829_v8 }
  0x20   : > { %174 = vperm.xlu1 %825, %v149_v9   ;;  %171 = vperm.xlu0 %824, %v148_v10  }
  0x22   : > { %740 = vmatpush3.bf16.msra.mxu0 %v829_v8  ;;  %776 = vmatpush3.bf16.msra.mxu1 %v829_v8 }
  0x23   : > { %741 = vmatprep.subr.bf16.mxu0 %v830_v11  ;;  %769 = vmatprep.subr.bf16.mxu1 %v830_v11 }
  0x24   : > { %198 = vperm.xlu1 %825, %v157_v12   ;;  %195 = vperm.xlu0 %824, %v156_v13  }
  0x26   : > { %742 = vmatpush3.bf16.msra.mxu0 %v830_v11  ;;  %777 = vmatpush3.bf16.msra.mxu1 %v830_v11 }
  0x27   : > { %743 = vmatprep.subr.bf16.mxu0 %v831_v14  ;;  %770 = vmatprep.subr.bf16.mxu1 %v831_v14 }
  0x28   : > { %180 = vperm.xlu1 %825, %v151_v15   ;;  %177 = vperm.xlu0 %824, %v150_v16  }
  0x2a   : > { %744 = vmatpush3.bf16.msra.mxu0 %v831_v14  ;;  %778 = vmatpush3.bf16.msra.mxu1 %v831_v14 }
  0x2b   : > { %745 = vmatprep.subr.bf16.mxu0 %v832_v17  ;;  %771 = vmatprep.subr.bf16.mxu1 %v832_v17 }
  0x2c   : > { %204 = vperm.xlu1 %825, %v159_v18   ;;  %201 = vperm.xlu0 %824, %v158_v19  }
  0x2e   : > { %746 = vmatpush3.bf16.msra.mxu0 %v832_v17  ;;  %779 = vmatpush3.bf16.msra.mxu1 %v832_v17 }
  0x2f   : > { %747 = vmatprep.subr.bf16.mxu0 %v833_v20  ;;  %772 = vmatprep.subr.bf16.mxu1 %v833_v20 }
  0x30   : > { %186 = vperm.xlu1 %825, %v153_v21   ;;  %183 = vperm.xlu0 %824, %v152_v22  }
  0x32   : > { %748 = vmatpush3.bf16.msra.mxu0 %v833_v20  ;;  %780 = vmatpush3.bf16.msra.mxu1 %v833_v20 }
  0x34   : > { %210 = vperm.xlu1 %825, %v161_v23   ;;  %207 = vperm.xlu0 %824, %v160_v24  }
  0x93   : > { %v190_v26 = vpop.permute.xlu1 %189  ;;  %v166_v27 = vpop.permute.xlu0 %165 }
  0x94   : > { %vm212_vm0 = vcmp.eq.s32.totalorder %v166_v27, %v163_v28  ;;  %vm220_vm3 = vcmp.eq.s32.totalorder %v190_v26, %v163_v28 }
  0x97   : > { %v193_v29 = vpop.permute.xlu1 %192  ;;  %v169_v30 = vpop.permute.xlu0 %168 }
  0x98   : > { %vm221_vm1 = vcmp.eq.s32.totalorder %v193_v29, %v163_v28  ;;  %vm213_vm2 = vcmp.eq.s32.totalorder %v169_v30, %v163_v28 }
  0x99   : > { %vm616_vm4 = vmpackc.low %vm213_vm2, %vm212_vm0 }
  0x9a   : > { %749 = vmatprep.mubr.msk.bf16.mxu0 %vm616_vm4, %v897_v31  ;;  %vm624_vm5 = vmpackc.low %vm221_vm1, %vm220_vm3 }
  0x9b   : > { %757 = vmatprep.mubr.msk.bf16.mxu1 %vm624_vm5, %v897_v31  ;;  %v175_v32 = vpop.permute.xlu1 %174  ;;  %v172_v33 = vpop.permute.xlu0 %171 }
  0x9c   : > { %vm215_vm6 = vcmp.eq.s32.totalorder %v175_v32, %v163_v28  ;;  %vm214_vm7 = vcmp.eq.s32.totalorder %v172_v33, %v163_v28 }
  0x9d   : > { %vm618_vm8 = vmpackc.low %vm215_vm6, %vm214_vm7 }
  0x9e   : > { %750 = vmatmul.mubr.msk.bf16.vlgmr.msra.gmra.mxu0 %vm618_vm8, %v897_v31 }
  0x9f   : > { %v199_v34 = vpop.permute.xlu1 %198  ;;  %v196_v35 = vpop.permute.xlu0 %195 }
  0xa0   : > { %vm223_vm9 = vcmp.eq.s32.totalorder %v199_v34, %v163_v28  ;;  %vm222_vm10 = vcmp.eq.s32.totalorder %v196_v35, %v163_v28 }
  0xa1   : > { %vm626_vm11 = vmpackc.low %vm223_vm9, %vm222_vm10 }
  0xa2   : > { %758 = vmatmul.mubr.msk.bf16.vlgmr.msra.gmra.mxu1 %vm626_vm11, %v897_v31 }
  0xa3   : > { %v181_v36 = vpop.permute.xlu1 %180  ;;  %v178_v37 = vpop.permute.xlu0 %177 }
  0xa4   : > { %vm217_vm12 = vcmp.eq.s32.totalorder %v181_v36, %v163_v28  ;;  %vm216_vm13 = vcmp.eq.s32.totalorder %v178_v37, %v163_v28 }
  0xa5   : > { %vm620_vm14 = vmpackc.low %vm217_vm12, %vm216_vm13 }
  0xa6   : > { %753 = vmatprep.mubr.msk.bf16.mxu0 %vm620_vm14, %v897_v31 }
  0xa7   : > { %v205_v38 = vpop.permute.xlu1 %204  ;;  %v202_v39 = vpop.permute.xlu0 %201 }
  0xa8   : > { %vm225_vm15 = vcmp.eq.s32.totalorder %v205_v38, %v163_v28  ;;  %vm224_vm0 = vcmp.eq.s32.totalorder %v202_v39, %v163_v28 }
  0xa9   : > { %vm628_vm1 = vmpackc.low %vm225_vm15, %vm224_vm0 }
  0xaa   : > { %761 = vmatprep.mubr.msk.bf16.mxu1 %vm628_vm1, %v897_v31 }
  0xab   : > { %v187_v40 = vpop.permute.xlu1 %186  ;;  %v184_v41 = vpop.permute.xlu0 %183 }
  0xac   : > { %vm219_vm2 = vcmp.eq.s32.totalorder %v187_v40, %v163_v28  ;;  %vm218_vm3 = vcmp.eq.s32.totalorder %v184_v41, %v163_v28 }
  0xad   : > { %vm622_vm4 = vmpackc.low %vm219_vm2, %vm218_vm3 }
  0xae   : > { %754 = vmatmul.mubr.msk.bf16.gmra.mxu0 %vm622_vm4, %v897_v31 }
  0xaf   : > { %v211_v42 = vpop.permute.xlu1 %210  ;;  %v208_v43 = vpop.permute.xlu0 %207 }
  0xb0   : > { %vm227_vm5 = vcmp.eq.s32.totalorder %v211_v42, %v163_v28  ;;  %vm226_vm6 = vcmp.eq.s32.totalorder %v208_v43, %v163_v28 }
  0xb1   : > { %vm630_vm7 = vmpackc.low %vm227_vm5, %vm226_vm6 }
  0xb2   : > { %762 = vmatmul.mubr.msk.bf16.gmra.mxu1 %vm630_vm7, %v897_v31 }
 0x15e   : > { %v751_v44 = vpop.f32.mrf.mxu0 }
 0x160   : > { %v366_v45 = vpop.f32.mrf.mxu0 }
 0x162   : > { %v752_v46 = vpop.f32.mrf.mxu0  ;;  %v759_v47 = vpop.f32.mrf.mxu1 }
 0x163   : > { %v678_v48 = vpack.c.bf16 %v752_v46, %v751_v44 }
 0x164   : > { %v369_v49 = vpop.f32.mrf.mxu0  ;;  %v398_v50 = vpop.f32.mrf.mxu1 }
 0x165   : > { %710 = vst [vmem:[%s137_s25 + $0x8] sm:$0xff] %v678_v48   ;;  %v673_v51 = vpack.c.bf16 %v369_v49, %v366_v45 }
 0x166   : > { %v760_v52 = vpop.f32.mrf.mxu1 }
 0x167   : > { %674 = vst [vmem:[%s137_s25] sm:$0xff] %v673_v51   ;;  %v698_v53 = vpack.c.bf16 %v760_v52, %v759_v47 }
 0x168   : > { %v401_v54 = vpop.f32.mrf.mxu1 }
 0x169   : > { %714 = vst [vmem:[%s137_s25 + $0x28] sm:$0xff] %v698_v53   ;;  %v693_v55 = vpack.c.bf16 %v401_v54, %v398_v50 }
 0x16b   : > { %713 = vst [vmem:[%s137_s25 + $0x20] sm:$0xff] %v693_v55  }
 0x16e   : > { %v755_v56 = vpop.f32.mrf.mxu0 }
 0x170   : > { %v382_v57 = vpop.f32.mrf.mxu0 }
 0x172   : > { %v756_v58 = vpop.f32.mrf.mxu0  ;;  %v763_v59 = vpop.f32.mrf.mxu1 }
 0x173   : > { %v688_v60 = vpack.c.bf16 %v756_v58, %v755_v56 }
 0x174   : > { %v385_v61 = vpop.f32.mrf.mxu0  ;;  %v414_v62 = vpop.f32.mrf.mxu1 }
 0x175   : > { %712 = vst [vmem:[%s137_s25 + $0x18] sm:$0xff] %v688_v60   ;;  %v683_v63 = vpack.c.bf16 %v385_v61, %v382_v57 }
 0x176   : > { %v764_v0 = vpop.f32.mrf.mxu1 }
 0x177   : > { %711 = vst [vmem:[%s137_s25 + $0x10] sm:$0xff] %v683_v63   ;;  %v708_v1 = vpack.c.bf16 %v764_v0, %v763_v59 }
 0x178   : > { %v417_v2 = vpop.f32.mrf.mxu1 }
 0x179   : > { %716 = vst [vmem:[%s137_s25 + $0x38] sm:$0xff] %v708_v1   ;;  %v703_v3 = vpack.c.bf16 %v417_v2, %v414_v62 }
 0x17b   : > { %715 = vst [vmem:[%s137_s25 + $0x30] sm:$0xff] %v703_v3  }
 0x17c   : > { %847 = shalt.err (!%p844_p3)
}
 0x17d   : > { %s848_s7 = scalar_lea.hbm %s1017_s30, 1024  ;;  %s852_s16 = scalar_lea.hbm %s1065_s2, 2048 }
 0x17e   : > { %p849_p4 = scmp.ne.s32.totalorder %s1017_s30, %s848_s7  ;;  %p853_p9 = scmp.lt.s32.totalorder %s1017_s30, %s1065_s2 }
 0x17f   : > { %p854_p10 = scmp.lt.s32.totalorder %s852_s16, %s848_s7 }
 0x180   : > { %p850_p7 = pnand %p849_p4, %p954_p5 }
 0x181   : > { %p855_p11 = por %p854_p10, %p853_p9 }
 0x182   : > { %p851_p8 = pneg %p850_p7 }
 0x184   : > { %p856_p12 = pnand %p855_p11, %p851_p8 }
 0x186   : > { %859 = shalt.err (!%p856_p12)
}
 0x187   : > { %s899_s22 = smov 64   ;;  %s900_s23 = smov 4  }
 0x188   : > { %781 = dma.vmem_to_hbm [thread:$0]  (%p954_p5), %s1019_s27, 1024, %s1017_s30, %s1023_s13, %s899_s22, %s899_s22, %s900_s23  }
 0x189 PF: > { %p787_p13 = scmp.ge.s32.totalorder %s894_s12, 2  ;;  %s538_s24 = sand.u32 1, %s882_s9  }
 0x18a   : > { %s539_s25 = scalar_lea.sflag [#allocation3], %s538_s24 }
 0x18b   : > { %p784_p0 = pnand %p787_p13, %p958_p6 }
 0x18d   : > { %p785_p1 = pneg %p784_p0 }
 0x18f   : > { %877 = dma.done.wait (%p785_p1), %s539_s25, 1024  }
 0x190   : > { %879 = vsyncadd (%p785_p1), %s539_s25, 4294966272  ;;  %p12_p2 = scmp.ge.s32.totalorder %s941_s15, 4   ;;  %s1068_s9 = smov %s886_s10 }
 0x191   : > { %s1069_s10 = smov %s890_s11  ;;  %s1070_s11 = smov %s952_s18 }
 0x192   : > { %s1071_s12 = smov %s941_s15  ;;  %14 = sbr.rel (!%p12_p2) target bundleno = 3 (0x3), region = 63 }
 0x197   :  { %544 = vsyncpa [#allocation3], 1 }
 0x198   :  { %546 = vsyncpa [#allocation3 + $0x1], 1 }

</bundles_post_ra>
